<compile_context>
chip_gen: v6e
topology: v6e:2x2x1
jax: 0.10.0
libtpu: 0.0.40
codegen_flags: <defaults>
</compile_context>

<pallas_src>
import functools

import jax
import jax.numpy as jnp
from jax.experimental import pallas as pl
from jax.experimental.pallas import tpu as pltpu

LANE = 128     # TPU lane width (last dim)
SUBLANE = 8    # f32 sublane count (second-to-last dim)


def _round_up(n, m):
    return ((n + m - 1) // m) * m


# ---------------------------------------------------------------------------
# Kernel
# ---------------------------------------------------------------------------

def grunet_seq_kernel(x_ref, h0_ref,
                      w1_ref, b1_ref,
                      wih_ref, bi_ref, whh_ref, bhn_ref,
                      w2_ref, b2_ref,
                      q_ref, hout_ref,
                      gi_scr, h_scr, *, hp, t, bp):
    """T GRU steps in one invocation.

    x_ref:   (T*Bp, Fp)   input features, weight dtype (bf16)
    h0_ref:  (Bp, Hp)     initial hidden state, f32
    wih/whh: (·, 3*Hp)    fused gate weights, PyTorch order (r, z, n)
    bi:      (1, 3*Hp)    bih+bhh for r/z, bih only for n
    bhn:     (1, Hp)      bhh of the n gate (added inside r*(...))
    q_ref:   (T*Bp, Ap)   f32 outputs;  hout_ref: (Bp, Hp) final hidden state
    gi_scr:  (T*Bp, 3Hp)  f32 scratch;  h_scr: (T*Bp, Hp) f32 scratch
    """
    f32 = jnp.float32

    # ---- Phase 1: batched non-recurrent matmuls (M = T*Bp) -----------------
    a_all = jnp.maximum(
        jnp.dot(x_ref[...], w1_ref[...], preferred_element_type=f32) + b1_ref[...],
        0.0)                                                            # (T*Bp, Hp)
    gi_scr[...] = (jnp.dot(a_all.astype(wih_ref.dtype), wih_ref[...],
                           preferred_element_type=f32) + bi_ref[...])   # (T*Bp, 3Hp)

    # ---- Phase 2: serial recurrence (only h @ Whh on the critical path) ----
    whh = whh_ref[...]
    bhn_b = jnp.broadcast_to(bhn_ref[...], (bp, hp))   # hoisted out of the loop

    def step(s, h):
        row = pl.multiple_of(s * bp, bp)
        gi = gi_scr[pl.ds(row, bp), :]                                   # (Bp, 3Hp)
        gh = jnp.dot(h.astype(whh.dtype), whh, preferred_element_type=f32)
        r = jax.nn.sigmoid(gi[:, 0 * hp:1 * hp] + gh[:, 0 * hp:1 * hp])
        z = jax.nn.sigmoid(gi[:, 1 * hp:2 * hp] + gh[:, 1 * hp:2 * hp])
        n = jnp.tanh(gi[:, 2 * hp:3 * hp] + r * (gh[:, 2 * hp:3 * hp] + bhn_b))
        h_new = (1.0 - z) * n + z * h
        h_scr[pl.ds(row, bp), :] = h_new
        return h_new

    h_fin = jax.lax.fori_loop(0, t, step, h0_ref[...], unroll=True)
    hout_ref[...] = h_fin

    # ---- Phase 3: batched output projection (M = T*Bp) ---------------------
    q_ref[...] = (jnp.dot(h_scr[...].astype(w2_ref.dtype), w2_ref[...],
                          preferred_element_type=f32) + b2_ref[...])


# ---------------------------------------------------------------------------
# Wrappers
# ---------------------------------------------------------------------------

def grunet_forward_seq(x_seq, h0, packed):
    """T GRU steps in one pallas_call. x_seq: (T, B, F), h0: (B, H)
    -> (q_seq: (T, B, A), h_final: (B, H))."""
    F, H, A = packed["dims"]
    Fp, Hp, Ap = packed["pdims"]
    T, B, _ = x_seq.shape
    Bp = _round_up(B, SUBLANE)
    wdt = packed["w1t"].dtype

    x_p = jnp.pad(x_seq.astype(jnp.float32),
                  ((0, 0), (0, Bp - B), (0, Fp - F))).astype(wdt).reshape(T * Bp, Fp)
    h0_p = jnp.pad(h0.astype(jnp.float32), ((0, Bp - B), (0, Hp - H)))

    vmem = lambda: pl.BlockSpec(memory_space=pltpu.MemorySpace.VMEM)
    q_p, h_fin_p = pl.pallas_call(
        functools.partial(grunet_seq_kernel, hp=Hp, t=T, bp=Bp),
        out_shape=(jax.ShapeDtypeStruct((T * Bp, Ap), jnp.float32),
                   jax.ShapeDtypeStruct((Bp, Hp), jnp.float32)),
        in_specs=[vmem() for _ in range(10)],
        out_specs=(vmem(), vmem()),
        scratch_shapes=[pltpu.VMEM((T * Bp, 3 * Hp), jnp.float32),
                        pltpu.VMEM((T * Bp, Hp), jnp.float32)],
        input_output_aliases={1: 1},      # reuse the h_in HBM buffer for h_out
    )(x_p, h0_p,
      packed["w1t"], packed["b1"],
      packed["wih"], packed["bi"], packed["whh"], packed["bhn"],
      packed["w2t"], packed["b2"])

    q_seq = q_p.reshape(T, Bp, Ap)[:, :B, :A]
    return q_seq, h_fin_p[:B, :H]


def grunet_forward(x, h, packed):
    """Single GRUNet step (== GRUNet.forward). x: (B, F), h: (B, H)."""
    q_seq, h_new = grunet_forward_seq(x[None, ...], h, packed)
    return q_seq[0], h_new


# ---------------------------------------------------------------------------
# Parameters
# ---------------------------------------------------------------------------

def init_raw_params(key, input_dim, hidden_dim, n_actions):
    """PyTorch-layout params with uniform(-1/sqrt(fan_in), 1/sqrt(fan_in)) init."""
    ks = jax.random.split(key, 8)

    def unif(k, shape, fan_in):
        bound = 1.0 / jnp.sqrt(jnp.float32(fan_in))
        return jax.random.uniform(k, shape, jnp.float32, -bound, bound)

    H, F, A = hidden_dim, input_dim, n_actions
    return {
        "w1": unif(ks[0], (H, F), F),        "b1": unif(ks[1], (H,), F),
        "wih": unif(ks[2], (3 * H, H), H),   "whh": unif(ks[3], (3 * H, H), H),
        "bih": unif(ks[4], (3 * H,), H),     "bhh": unif(ks[5], (3 * H,), H),
        "w2": unif(ks[6], (A, H), H),        "b2": unif(ks[7], (A,), H),
    }


def pack_params(raw, input_dim, hidden_dim, n_actions, weight_dtype=jnp.bfloat16):
    """Transpose, fuse gates, fold biases, pad lane dims to 128 (contraction dim of
    fc1 only to a sublane multiple), and cast matmul weights to `weight_dtype`."""
    F, H, A = input_dim, hidden_dim, n_actions
    Fp = _round_up(F, SUBLANE)   # contraction dim: sublane multiple is enough
    Hp = _round_up(H, LANE)      # lane dims stay 128-aligned (dense gate slices/stores)
    Ap = _round_up(A, LANE)

    def pad2(m, rows, cols):
        return jnp.pad(m, ((0, rows - m.shape[0]),
                           (0, cols - m.shape[1]))).astype(weight_dtype)

    def pad_row(v, cols):        # biases stay f32 (added to f32 accumulators)
        return jnp.pad(v, (0, cols - v.shape[0])).reshape(1, cols).astype(jnp.float32)

    wih = raw["wih"].reshape(3, H, H)   # PyTorch gate order r, z, n; each (out, in)
    whh = raw["whh"].reshape(3, H, H)
    bih = raw["bih"].reshape(3, H)
    bhh = raw["bhh"].reshape(3, H)

    return {
        "w1t": pad2(raw["w1"].T, Fp, Hp),                                          # (Fp, Hp)
        "b1":  pad_row(raw["b1"], Hp),                                             # (1, Hp)
        # fused gate weights, x @ W layout; each gate padded to its own 128-lane block
        "wih": jnp.concatenate([pad2(wih[g].T, Hp, Hp) for g in range(3)], axis=1),  # (Hp, 3Hp)
        "whh": jnp.concatenate([pad2(whh[g].T, Hp, Hp) for g in range(3)], axis=1),  # (Hp, 3Hp)
        # r/z biases folded (bih+bhh); n gate keeps bhh separate (it is gated by r)
        "bi":  jnp.concatenate([pad_row(bih[0] + bhh[0], Hp),
                                pad_row(bih[1] + bhh[1], Hp),
                                pad_row(bih[2], Hp)], axis=1),                     # (1, 3Hp)
        "bhn": pad_row(bhh[2], Hp),                                                # (1, Hp)
        "w2t": pad2(raw["w2"].T, Hp, Ap),                                          # (Hp, Ap)
        "b2":  pad_row(raw["b2"], Ap),                                             # (1, Ap)
        "dims": (F, H, A),
        "pdims": (Fp, Hp, Ap),
    }


# ---------------------------------------------------------------------------
# Pure-JAX reference (PyTorch GRUCell semantics) for correctness checks
# ---------------------------------------------------------------------------

def grunet_reference(x, h, raw):
    H = h.shape[-1]
    a = jnp.maximum(x @ raw["w1"].T + raw["b1"], 0.0)
    gi = a @ raw["wih"].T + raw["bih"]
    gh = h @ raw["whh"].T + raw["bhh"]
    r = jax.nn.sigmoid(gi[:, :H] + gh[:, :H])
    z = jax.nn.sigmoid(gi[:, H:2 * H] + gh[:, H:2 * H])
    n = jnp.tanh(gi[:, 2 * H:] + r * gh[:, 2 * H:])
    h_new = (1.0 - z) * n + z * h
    q = h_new @ raw["w2"].T + raw["b2"]
    return q, h_new


if __name__ == "__main__":
    B, INPUT, HIDDEN, N_ACTIONS, SEQ = 2, 16, 32, 4, 8

    key = jax.random.PRNGKey(0)
    k_par, k_x, k_seq = jax.random.split(key, 3)

    raw = init_raw_params(k_par, INPUT, HIDDEN, N_ACTIONS)
    packed = pack_params(raw, INPUT, HIDDEN, N_ACTIONS)   # bf16 matmul weights

    # --- single step (matches GRUNet.forward) ---
    x = jax.random.normal(k_x, (B, INPUT), jnp.float32)
    h0 = jnp.zeros((B, HIDDEN), jnp.float32)               # init_hidden(), batched

    q, h_new = grunet_forward(x, h0, packed)
    q, h_new = jax.block_until_ready(q), jax.block_until_ready(h_new)

    q_ref, h_ref = grunet_reference(x, h0, raw)
    assert q.shape == (B, N_ACTIONS) and h_new.shape == (B, HIDDEN)
    assert jnp.allclose(q, q_ref, atol=2e-2, rtol=2e-2)
    assert jnp.allclose(h_new, h_ref, atol=2e-2, rtol=2e-2)

    # --- sequence: SEQ GRU steps inside one pallas_call (no grid) ---
    x_seq = jax.random.normal(k_seq, (SEQ, B, INPUT), jnp.float32)
    q_seq, h_fin = grunet_forward_seq(x_seq, h0, packed)
    q_seq, h_fin = jax.block_until_ready(q_seq), jax.block_until_ready(h_fin)

    h_r = h0
    q_list = []
    for t in range(SEQ):
        q_t, h_r = grunet_reference(x_seq[t], h_r, raw)
        q_list.append(q_t)
    q_seq_ref = jnp.stack(q_list, axis=0)

    assert q_seq.shape == (SEQ, B, N_ACTIONS) and h_fin.shape == (B, HIDDEN)
    assert jnp.allclose(q_seq, q_seq_ref, atol=3e-2, rtol=3e-2)
    assert jnp.allclose(h_fin, h_r, atol=3e-2, rtol=3e-2)

    print("KERNEL_OK")
</pallas_src>

<mosaic_0001>
module attributes {stable_mosaic.version = 11 : i64} {
  func.func @grunet_seq_kernel(%arg0: memref<8x16xbf16, #tpu.memory_space<vmem>>, %arg1: memref<8x128xf32, #tpu.memory_space<vmem>>, %arg2: memref<16x128xbf16, #tpu.memory_space<vmem>>, %arg3: memref<1x128xf32, #tpu.memory_space<vmem>>, %arg4: memref<128x384xbf16, #tpu.memory_space<vmem>>, %arg5: memref<1x384xf32, #tpu.memory_space<vmem>>, %arg6: memref<128x384xbf16, #tpu.memory_space<vmem>>, %arg7: memref<1x128xf32, #tpu.memory_space<vmem>>, %arg8: memref<128x128xbf16, #tpu.memory_space<vmem>>, %arg9: memref<1x128xf32, #tpu.memory_space<vmem>>, %arg10: memref<8x128xf32, #tpu.memory_space<vmem>>, %arg11: memref<8x128xf32, #tpu.memory_space<vmem>>, %arg12: memref<8x384xf32, #tpu.memory_space<vmem>>, %arg13: memref<8x128xf32, #tpu.memory_space<vmem>>) attributes {dimension_semantics = [], scalar_prefetch = 0 : i64, scratch_operands = 2 : i64, tpu.core_type = #tpu.core_type<tc>} {
    %c0 = arith.constant 0 : index
    %c0_0 = arith.constant 0 : index
    %0 = vector.load %arg0[%c0, %c0_0] : memref<8x16xbf16, #tpu.memory_space<vmem>>, vector<8x16xbf16>
    %c0_1 = arith.constant 0 : index
    %c0_2 = arith.constant 0 : index
    %1 = vector.load %arg2[%c0_1, %c0_2] : memref<16x128xbf16, #tpu.memory_space<vmem>>, vector<16x128xbf16>
    %cst = arith.constant dense<0.000000e+00> : vector<8x128xf32>
    %2 = tpu.matmul %0, %1, %cst {dimension_numbers = #tpu.dot_dimension_numbers<[1], [0], [0], [1], [0, 0, 1, 1], [], []>} : vector<8x16xbf16>, vector<16x128xbf16>, vector<8x128xf32> -> vector<8x128xf32>
    %c0_3 = arith.constant 0 : index
    %c0_4 = arith.constant 0 : index
    %3 = vector.load %arg3[%c0_3, %c0_4] : memref<1x128xf32, #tpu.memory_space<vmem>>, vector<1x128xf32>
    %4 = vector.broadcast %3 : vector<1x128xf32> to vector<8x128xf32>
    %5 = arith.addf %2, %4 : vector<8x128xf32>
    %cst_5 = arith.constant 0.000000e+00 : f32
    %6 = vector.broadcast %cst_5 : f32 to vector<8x128xf32>
    %7 = arith.maximumf %5, %6 : vector<8x128xf32>
    %8 = arith.truncf %7 : vector<8x128xf32> to vector<8x128xbf16>
    %c0_6 = arith.constant 0 : index
    %c0_7 = arith.constant 0 : index
    %9 = vector.load %arg4[%c0_6, %c0_7] : memref<128x384xbf16, #tpu.memory_space<vmem>>, vector<128x384xbf16>
    %cst_8 = arith.constant dense<0.000000e+00> : vector<8x384xf32>
    %10 = tpu.matmul %8, %9, %cst_8 {dimension_numbers = #tpu.dot_dimension_numbers<[1], [0], [0], [1], [0, 0, 1, 1], [], []>} : vector<8x128xbf16>, vector<128x384xbf16>, vector<8x384xf32> -> vector<8x384xf32>
    %c0_9 = arith.constant 0 : index
    %c0_10 = arith.constant 0 : index
    %11 = vector.load %arg5[%c0_9, %c0_10] : memref<1x384xf32, #tpu.memory_space<vmem>>, vector<1x384xf32>
    %12 = vector.broadcast %11 : vector<1x384xf32> to vector<8x384xf32>
    %13 = arith.addf %10, %12 : vector<8x384xf32>
    %c0_11 = arith.constant 0 : index
    %c0_12 = arith.constant 0 : index
    %14 = vector.load %arg12[%c0_11, %c0_12] : memref<8x384xf32, #tpu.memory_space<vmem>>, vector<8x384xf32>
    tpu.vector_store %arg12[%c0_11, %c0_12], %13 {strides = array<i32>} : memref<8x384xf32, #tpu.memory_space<vmem>>, vector<8x384xf32>,
    %c0_13 = arith.constant 0 : index
    %c0_14 = arith.constant 0 : index
    %15 = vector.load %arg6[%c0_13, %c0_14] : memref<128x384xbf16, #tpu.memory_space<vmem>>, vector<128x384xbf16>
    %c0_15 = arith.constant 0 : index
    %c0_16 = arith.constant 0 : index
    %16 = vector.load %arg7[%c0_15, %c0_16] : memref<1x128xf32, #tpu.memory_space<vmem>>, vector<1x128xf32>
    %17 = vector.shape_cast %16 : vector<1x128xf32> to vector<1x128xf32>
    %18 = vector.broadcast %17 : vector<1x128xf32> to vector<8x128xf32>
    %c0_17 = arith.constant 0 : index
    %c0_18 = arith.constant 0 : index
    %19 = vector.load %arg1[%c0_17, %c0_18] : memref<8x128xf32, #tpu.memory_space<vmem>>, vector<8x128xf32>
    %c0_i32 = arith.constant 0 : i32
    %c8_i32 = arith.constant 8 : i32
    %20 = arith.muli %c0_i32, %c8_i32 : i32
    %21 = tpu.assume_multiple %20, 8 : i32
    %22 = arith.index_cast %21 : i32 to index
    %c0_19 = arith.constant 0 : index
    %23 = vector.load %arg12[%22, %c0_19] : memref<8x384xf32, #tpu.memory_space<vmem>>, vector<8x384xf32>
    %24 = arith.truncf %19 : vector<8x128xf32> to vector<8x128xbf16>
    %cst_20 = arith.constant dense<0.000000e+00> : vector<8x384xf32>
    %25 = tpu.matmul %24, %15, %cst_20 {dimension_numbers = #tpu.dot_dimension_numbers<[1], [0], [0], [1], [0, 0, 1, 1], [], []>} : vector<8x128xbf16>, vector<128x384xbf16>, vector<8x384xf32> -> vector<8x384xf32>
    %26 = vector.extract_strided_slice %23 {offsets = [0, 0], sizes = [8, 128], strides = [1, 1]} : vector<8x384xf32> to vector<8x128xf32>
    %27 = vector.extract_strided_slice %25 {offsets = [0, 0], sizes = [8, 128], strides = [1, 1]} : vector<8x384xf32> to vector<8x128xf32>
    %28 = arith.addf %26, %27 : vector<8x128xf32>
    %29 = arith.negf %28 : vector<8x128xf32>
    %30 = math.exp %29 : vector<8x128xf32>
    %cst_21 = arith.constant 1.000000e+00 : f32
    %31 = vector.broadcast %cst_21 : f32 to vector<8x128xf32>
    %32 = arith.addf %31, %30 : vector<8x128xf32>
    %33 = arith.divf %31, %32 : vector<8x128xf32>
    %34 = vector.extract_strided_slice %23 {offsets = [0, 128], sizes = [8, 128], strides = [1, 1]} : vector<8x384xf32> to vector<8x128xf32>
    %35 = vector.extract_strided_slice %25 {offsets = [0, 128], sizes = [8, 128], strides = [1, 1]} : vector<8x384xf32> to vector<8x128xf32>
    %36 = arith.addf %34, %35 : vector<8x128xf32>
    %37 = arith.negf %36 : vector<8x128xf32>
    %38 = math.exp %37 : vector<8x128xf32>
    %cst_22 = arith.constant 1.000000e+00 : f32
    %39 = vector.broadcast %cst_22 : f32 to vector<8x128xf32>
    %40 = arith.addf %39, %38 : vector<8x128xf32>
    %41 = arith.divf %39, %40 : vector<8x128xf32>
    %42 = vector.extract_strided_slice %23 {offsets = [0, 256], sizes = [8, 128], strides = [1, 1]} : vector<8x384xf32> to vector<8x128xf32>
    %43 = vector.extract_strided_slice %25 {offsets = [0, 256], sizes = [8, 128], strides = [1, 1]} : vector<8x384xf32> to vector<8x128xf32>
    %44 = arith.addf %43, %18 : vector<8x128xf32>
    %45 = arith.mulf %33, %44 : vector<8x128xf32>
    %46 = arith.addf %42, %45 : vector<8x128xf32>
    %47 = math.tanh %46 : vector<8x128xf32>
    %cst_23 = arith.constant 1.000000e+00 : f32
    %48 = vector.broadcast %cst_23 : f32 to vector<8x128xf32>
    %49 = arith.subf %48, %41 : vector<8x128xf32>
    %50 = arith.mulf %49, %47 : vector<8x128xf32>
    %51 = arith.mulf %41, %19 : vector<8x128xf32>
    %52 = arith.addf %50, %51 : vector<8x128xf32>
    %53 = arith.index_cast %21 : i32 to index
    %c0_24 = arith.constant 0 : index
    %54 = vector.load %arg13[%53, %c0_24] : memref<8x128xf32, #tpu.memory_space<vmem>>, vector<8x128xf32>
    tpu.vector_store %arg13[%53, %c0_24], %52 {strides = array<i32>} : memref<8x128xf32, #tpu.memory_space<vmem>>, vector<8x128xf32>,
    %c1_i32 = arith.constant 1 : i32
    %c0_25 = arith.constant 0 : index
    %c0_26 = arith.constant 0 : index
    %55 = vector.load %arg11[%c0_25, %c0_26] : memref<8x128xf32, #tpu.memory_space<vmem>>, vector<8x128xf32>
    tpu.vector_store %arg11[%c0_25, %c0_26], %52 {strides = array<i32>} : memref<8x128xf32, #tpu.memory_space<vmem>>, vector<8x128xf32>,
    %c0_27 = arith.constant 0 : index
    %c0_28 = arith.constant 0 : index
    %56 = vector.load %arg13[%c0_27, %c0_28] : memref<8x128xf32, #tpu.memory_space<vmem>>, vector<8x128xf32>
    %57 = arith.truncf %56 : vector<8x128xf32> to vector<8x128xbf16>
    %c0_29 = arith.constant 0 : index
    %c0_30 = arith.constant 0 : index
    %58 = vector.load %arg8[%c0_29, %c0_30] : memref<128x128xbf16, #tpu.memory_space<vmem>>, vector<128x128xbf16>
    %cst_31 = arith.constant dense<0.000000e+00> : vector<8x128xf32>
    %59 = tpu.matmul %57, %58, %cst_31 {dimension_numbers = #tpu.dot_dimension_numbers<[1], [0], [0], [1], [0, 0, 1, 1], [], []>} : vector<8x128xbf16>, vector<128x128xbf16>, vector<8x128xf32> -> vector<8x128xf32>
    %c0_32 = arith.constant 0 : index
    %c0_33 = arith.constant 0 : index
    %60 = vector.load %arg9[%c0_32, %c0_33] : memref<1x128xf32, #tpu.memory_space<vmem>>, vector<1x128xf32>
    %61 = vector.broadcast %60 : vector<1x128xf32> to vector<8x128xf32>
    %62 = arith.addf %59, %61 : vector<8x128xf32>
    %c0_34 = arith.constant 0 : index
    %c0_35 = arith.constant 0 : index
    %63 = vector.load %arg10[%c0_34, %c0_35] : memref<8x128xf32, #tpu.memory_space<vmem>>, vector<8x128xf32>
    tpu.vector_store %arg10[%c0_34, %c0_35], %62 {strides = array<i32>} : memref<8x128xf32, #tpu.memory_space<vmem>>, vector<8x128xf32>,
    return
  }
}

</mosaic_0001>

<bundles_post_ra>
// kernel: tpu_custom_call.1
= control target key start
LH: loop header
LB: loop body
LE: loop exit
PB: predicated region body
PF: predicated region fallthrough
CT: control target
= control target key end

     0   :  { %17 = vsyncpa [#allocation5], 0  ;;  %s1411_s0 = inlined_call_operand.vmem [shape: bf16[8,16], index: 0, kind: input, shape index: {}]   ;;  %s1412_s1 = inlined_call_operand.hbm [shape: f32[8,128], index: 1, kind: input, shape index: {}, may-alias: {1,11}]   ;;  %s1413_s2 = inlined_call_operand.vmem [shape: bf16[16,128], index: 2, kind: input, shape index: {}]   ;;  %s1414_s3 = inlined_call_operand.vmem [shape: f32[1,128], index: 3, kind: input, shape index: {}]   ;;  %s1415_s4 = inlined_call_operand.hbm [shape: bf16[128,384], index: 4, kind: input, shape index: {}]   ;;  %s1416_s5 = inlined_call_operand.vmem [shape: f32[1,384], index: 5, kind: input, shape index: {}]   ;;  %s1417_s6 = inlined_call_operand.hbm [shape: bf16[128,384], index: 6, kind: input, shape index: {}]   ;;  %s1418_s7 = inlined_call_operand.vmem [shape: f32[1,128], index: 7, kind: input, shape index: {}]   ;;  %s1419_s8 = inlined_call_operand.hbm [shape: bf16[128,128], index: 8, kind: input, shape index: {}]   ;;  %s1420_s9 = inlined_call_operand.hbm [shape: f32[1,128], index: 9, kind: input, shape index: {}]   ;;  %s1421_s10 = inlined_call_operand.hbm [shape: f32[8,128], index: 10, kind: output, shape index: {0}]   ;;  %s1422_s11 = inlined_call_operand.hbm [shape: f32[8,128], index: 11, kind: output, shape index: {1}, may-alias: {1,11}]  }
   0x1   :  { %18 = vsyncpa [#allocation8], 0 }
   0x2   :  { %19 = vsyncpa [#allocation11], 0 }
   0x3   :  { %20 = vsyncpa [#allocation6], 0 }
   0x4   :  { %21 = vsyncpa [#allocation15], 0  ;;  %s1257_s17 = smov [#allocation7]  }
   0x5   :  { %s43_s18 = sshll.u32 %s1257_s17, 4  ;;  %s44_s18 = int_to_ptr.vmem [resolvable:$true] %s43_s18 }
   0x6   :  { %s1115_s19 = scalar_lea.vmem %s44_s18, 3072  ;;  %p1120_p1 = scmp.lt.s32.totalorder %s44_s18, %s44_s18 }
   0x7   :  { %p1116_p0 = scmp.ne.s32.totalorder %s44_s18, %s1115_s19  ;;  %p1121_p2 = scmp.lt.s32.totalorder %s1115_s19, %s1115_s19 }
   0x9   :  { %p1122_p3 = por %p1121_p2, %p1120_p1 }
   0xb   :  { %p1123_p4 = pnand %p1122_p3, %p1116_p0 }
   0xd   :  { %1126 = shalt.err (!%p1123_p4)
}
   0xe   :  { %s1258_s20 = smov 192   ;;  %s1259_s21 = smov 12  }
   0xf   :  { %49 = dma.hbm_to_vmem [thread:$0]  %s1415_s4, 3072, %s44_s18, [#allocation8], %s1258_s20, %s1258_s20, %s1259_s21  }
  0x10   :  { %s1260_s24 = smov [#allocation10]  }
  0x11   :  { %s71_s25 = sshll.u32 %s1260_s24, 4  ;;  %s72_s25 = int_to_ptr.vmem [resolvable:$true] %s71_s25 }
  0x12   :  { %s1135_s26 = scalar_lea.vmem %s72_s25, 1024  ;;  %p1140_p6 = scmp.lt.s32.totalorder %s72_s25, %s72_s25 }
  0x13   :  { %p1136_p5 = scmp.ne.s32.totalorder %s72_s25, %s1135_s26  ;;  %p1141_p7 = scmp.lt.s32.totalorder %s1135_s26, %s1135_s26 }
  0x15   :  { %p1142_p8 = por %p1141_p7, %p1140_p6 }
  0x17   :  { %p1143_p9 = pnand %p1142_p8, %p1136_p5 }
  0x19   :  { %1146 = shalt.err (!%p1143_p9)
}
  0x1a   :  { %s1261_s27 = smov 64   ;;  %s1262_s28 = smov 4  }
  0x1b   :  { %77 = dma.hbm_to_vmem [thread:$0]  %s1419_s8, 1024, %s72_s25, [#allocation11], %s1261_s27, %s1261_s27, %s1262_s28  }
  0x1c   :  { %s1263_s12 = smov [#allocation4]   ;;  %s1264_s14 = smov [#allocation9]  }
  0x1d   :  { %s30_s13 = sshll.u32 %s1263_s12, 4  ;;  %s57_s4 = sshll.u32 %s1264_s14, 4  ;;  %s31_s13 = int_to_ptr.vmem [resolvable:$true] %s30_s13  ;;  %s58_s4 = int_to_ptr.vmem [resolvable:$true] %s57_s4 }
  0x1e   :  { %s1155_s15 = scalar_lea.vmem %s31_s13, 128  ;;  %p1160_p11 = scmp.lt.s32.totalorder %s31_s13, %s31_s13 }
  0x1f   :  { %p1156_p10 = scmp.ne.s32.totalorder %s31_s13, %s1155_s15  ;;  %p1161_p12 = scmp.lt.s32.totalorder %s1155_s15, %s1155_s15 }
  0x21   :  { %p1162_p13 = por %p1161_p12, %p1160_p11 }
  0x23   :  { %p1163_p0 = pnand %p1162_p13, %p1156_p10 }
  0x25   :  { %1166 = shalt.err (!%p1163_p0)
}
  0x26   :  { %33 = dma.hbm_to_vmem [thread:$0]  %s1412_s1, 128, %s31_s13, [#allocation5]  }
  0x27   :  { %s1175_s18 = scalar_lea.vmem %s58_s4, 3072  ;;  %p1180_p2 = scmp.lt.s32.totalorder %s58_s4, %s58_s4 }
  0x28   :  { %p1176_p1 = scmp.ne.s32.totalorder %s58_s4, %s1175_s18  ;;  %p1181_p3 = scmp.lt.s32.totalorder %s1175_s18, %s1175_s18 }
  0x2a   :  { %p1182_p4 = por %p1181_p3, %p1180_p2 }
  0x2c   :  { %p1183_p5 = pnand %p1182_p4, %p1176_p1 }
  0x2e   :  { %1186 = shalt.err (!%p1183_p5)
}
  0x2f   :  { %63 = dma.hbm_to_vmem [thread:$0]  %s1417_s6, 3072, %s58_s4, [#allocation8], %s1258_s20, %s1258_s20, %s1259_s21  }
  0x30   :  { %s1265_s22 = smov [#allocation12]  }
  0x31   :  { %s84_s23 = sshll.u32 %s1265_s22, 4  ;;  %s85_s23 = int_to_ptr.vmem [resolvable:$true] %s84_s23 }
  0x32   :  { %s1195_s24 = scalar_lea.vmem %s85_s23, 16  ;;  %s1199_s1 = scalar_lea.vmem %s85_s23, 32 }
  0x33   :  { %p1196_p6 = scmp.ne.s32.totalorder %s85_s23, %s1195_s24  ;;  %p1200_p7 = scmp.lt.s32.totalorder %s85_s23, %s85_s23 }
  0x34   :  { %p1201_p8 = scmp.lt.s32.totalorder %s1199_s1, %s1195_s24 }
  0x36   :  { %p1202_p9 = por %p1201_p8, %p1200_p7 }
  0x38   :  { %p1203_p10 = pnand %p1202_p9, %p1196_p6 }
  0x3a   :  { %1206 = shalt.err (!%p1203_p10)
}
  0x3b   :  { %87 = dma.hbm_to_vmem [thread:$0]  %s1420_s9, 16, %s85_s23, [#allocation11]  }
  0x3c   :  { %1247 = dma.done.wait [#allocation5], 128  }
  0x3d   :  { %1248 = vsyncadd [#allocation5], 4294967168 }
  0x3e   :  { %1249 = dma.done.wait [#allocation8], 6144  }
  0x3f   :  { %1250 = vsyncadd [#allocation8], 4294961152 }
  0x40   :  { %1251 = dma.done.wait [#allocation11], 1040  }
  0x41   :  { %1252 = vsyncadd [#allocation11], 4294966256  ;;  %v1266_v0 = vmov 0.0   ;;  %vm1267_vm0 = vmmov 0   ;;  %v1024_v1 = vld [vmem:[%s1413_s2] sm:$0xff]   ;;  %vm120_vm1 = vcmask 130048  }
  0x42   :  { %944 = vmatprep.subr.bf16.mxu0 %v1266_v0  ;;  %946 = vmatprep.mubr.msk.bf16.mxu0 %vm1267_vm0, %v1266_v0  ;;  %v104_v2 = vld [vmem:[%s1411_s0] sm:$0xf]  ;;  %v1027_v4 = vld [vmem:[#allocation7 + $0xa8] ss:$12 sps:$4 sm:$0xff]   ;;  %v1028_v5 = vld [vmem:[#allocation7 + $0xb0] ss:$12 sps:$4 sm:$0xff]  }
  0x43   :  { %945 = vmatpush3.bf16.msra.mxu0 %v1024_v1  ;;  %v1025_v3 = vld [vmem:[#allocation7 + $0xac] ss:$12 sps:$4 sm:$0xff]   ;;  %v1029_v6 = vld [vmem:[#allocation7 + $0x94] ss:$12 sps:$4 sm:$0xff]   ;;  %v1031_v7 = vld [vmem:[#allocation7 + $0x90] ss:$12 sps:$4 sm:$0xff]  }
  0x44   :  { %950 = vmatprep.subr.bf16.mxu0 %v1266_v0  ;;  %343 = vmatprep.subr.bf16.mxu1 %v1025_v3  ;;  %v1032_v8 = vld [vmem:[#allocation7 + $0x98] ss:$12 sps:$4 sm:$0xff]   ;;  %v1033_v9 = vld [vmem:[#allocation7 + $0x7c] ss:$12 sps:$4 sm:$0xff]   ;;  %v1036_v11 = vld [vmem:[#allocation7 + $0x80] ss:$12 sps:$4 sm:$0xff]  }
  0x45   :  { %344 = vmatpush1.bf16.msra.mxu1 %v1027_v4  ;;  %v1035_v10 = vld [vmem:[#allocation7 + $0x78] ss:$12 sps:$4 sm:$0xff]   ;;  %v1039_v13 = vld [vmem:[#allocation7 + $0x60] ss:$12 sps:$4 sm:$0xff]   ;;  %v1040_v14 = vld [vmem:[#allocation7 + $0x68] ss:$12 sps:$4 sm:$0xff]  }
  0x46   :  { %947 = vmatmul.mubr.msk.bf16.vlgmr.msra.gmra.mxu0 %vm120_vm1, %v104_v2  ;;  %345 = vmatprep.subr.bf16.mxu1 %v1029_v6  ;;  %v1037_v12 = vld [vmem:[#allocation7 + $0x64] ss:$12 sps:$4 sm:$0xff]   ;;  %v1041_v15 = vld [vmem:[#allocation7 + $0x4c] ss:$12 sps:$4 sm:$0xff]   ;;  %v1043_v16 = vld [vmem:[#allocation7 + $0x48] ss:$12 sps:$4 sm:$0xff]  }
  0x47   :  { %951 = vmatpush3.bf16.msra.mxu0 %v1028_v5  ;;  %966 = vmatprep.mubr.msk.bf16.mxu0 %vm1267_vm0, %v1266_v0  ;;  %v1044_v17 = vld [vmem:[#allocation7 + $0x50] ss:$12 sps:$4 sm:$0xff]   ;;  %v1045_v18 = vld [vmem:[#allocation7 + $0x34] ss:$12 sps:$4 sm:$0xff]   ;;  %v1048_v20 = vld [vmem:[#allocation7 + $0x38] ss:$12 sps:$4 sm:$0xff]  }
  0x48   :  { %952 = vmatprep.subr.bf16.mxu0 %v1266_v0  ;;  %v1047_v19 = vld [vmem:[#allocation7 + $0x30] ss:$12 sps:$4 sm:$0xff]   ;;  %v1051_v22 = vld [vmem:[#allocation7 + $0x18] ss:$12 sps:$4 sm:$0xff]   ;;  %v1052_v23 = vld [vmem:[#allocation7 + $0x20] ss:$12 sps:$4 sm:$0xff]  }
  0x49   :  { %346 = vmatpush1.bf16.msra.mxu1 %v1031_v7  ;;  %v1049_v21 = vld [vmem:[#allocation7 + $0x1c] ss:$12 sps:$4 sm:$0xff]   ;;  %v1053_v24 = vld [vmem:[#allocation7 + $0x4] ss:$12 sps:$4 sm:$0xff]   ;;  %v1055_v25 = vld [vmem:[#allocation7] ss:$12 sps:$4 sm:$0xff]  }
  0x4a   :  { %347 = vmatprep.subr.bf16.mxu1 %v1033_v9  ;;  %v1056_v26 = vld [vmem:[#allocation7 + $0x8] ss:$12 sps:$4 sm:$0xff]   ;;  %v1059_v27 = vld [vmem:[#allocation9 + $0xac] ss:$12 sps:$4 sm:$0xff]   ;;  %v1268_v28 = vmov 0   ;;  %v1092_v2 = vld [vmem:[#allocation10 + $0x20] sm:$0xff]  }
  0x4b   :  { %953 = vmatpush3.bf16.msra.mxu0 %v1032_v8  ;;  %375 = vmatprep.mubr.bf16.mxu1 %v1268_v28  ;;  %v852_v29 = vld [vmem:[%s1414_s3] ss:$0 sm:$0xff]  ;;  %v1057_v35 = vld [vmem:[#allocation9 + $0xa8] ss:$12 sps:$4 sm:$0xff]   ;;  %v1078_v36 = vld [vmem:[#allocation9 + $0xb0] ss:$12 sps:$4 sm:$0xff]  }
  0x4c   :  { %954 = vmatprep.subr.bf16.mxu0 %v1266_v0  ;;  %v1062_v38 = vld [vmem:[#allocation9 + $0x94] ss:$12 sps:$4 sm:$0xff]   ;;  %v1060_v40 = vld [vmem:[#allocation9 + $0x90] ss:$12 sps:$4 sm:$0xff]   ;;  %v1082_v41 = vld [vmem:[#allocation9 + $0x98] ss:$12 sps:$4 sm:$0xff]  }
  0x4d   :  { %348 = vmatpush1.bf16.msra.mxu1 %v1035_v10  ;;  %v1065_v42 = vld [vmem:[#allocation9 + $0x7c] ss:$12 sps:$4 sm:$0xff]   ;;  %v1063_v43 = vld [vmem:[#allocation9 + $0x78] ss:$12 sps:$4 sm:$0xff]   ;;  %v1083_v44 = vld [vmem:[#allocation9 + $0x80] ss:$12 sps:$4 sm:$0xff]  }
  0x4e   :  { %349 = vmatprep.subr.bf16.mxu1 %v1037_v12  ;;  %v1068_v45 = vld [vmem:[#allocation9 + $0x64] ss:$12 sps:$4 sm:$0xff]   ;;  %v1066_v46 = vld [vmem:[#allocation9 + $0x60] ss:$12 sps:$4 sm:$0xff]   ;;  %v1084_v47 = vld [vmem:[#allocation9 + $0x68] ss:$12 sps:$4 sm:$0xff]  }
  0x4f   :  { %955 = vmatpush3.bf16.msra.mxu0 %v1036_v11  ;;  %v1071_v48 = vld [vmem:[#allocation9 + $0x4c] ss:$12 sps:$4 sm:$0xff]   ;;  %v1069_v49 = vld [vmem:[#allocation9 + $0x48] ss:$12 sps:$4 sm:$0xff]   ;;  %v1085_v50 = vld [vmem:[#allocation9 + $0x50] ss:$12 sps:$4 sm:$0xff]  }
  0x50   :  { %956 = vmatprep.subr.bf16.mxu0 %v1266_v0  ;;  %v1074_v51 = vld [vmem:[#allocation9 + $0x34] ss:$12 sps:$4 sm:$0xff]   ;;  %v1072_v52 = vld [vmem:[#allocation9 + $0x30] ss:$12 sps:$4 sm:$0xff]   ;;  %v1086_v53 = vld [vmem:[#allocation9 + $0x38] ss:$12 sps:$4 sm:$0xff]  }
  0x51   :  { %350 = vmatpush1.bf16.msra.mxu1 %v1039_v13  ;;  %v1077_v54 = vld [vmem:[#allocation9 + $0x1c] ss:$12 sps:$4 sm:$0xff]   ;;  %v1075_v55 = vld [vmem:[#allocation9 + $0x18] ss:$12 sps:$4 sm:$0xff]   ;;  %v1087_v56 = vld [vmem:[#allocation9 + $0x20] ss:$12 sps:$4 sm:$0xff]  }
  0x52   :  { %351 = vmatprep.subr.bf16.mxu1 %v1041_v15  ;;  %v1081_v57 = vld [vmem:[#allocation9 + $0x4] ss:$12 sps:$4 sm:$0xff]   ;;  %v1079_v58 = vld [vmem:[#allocation9] ss:$12 sps:$4 sm:$0xff]   ;;  %v1383_v59 = vld [vmem:[#allocation4] sm:$0xff]  ;;  %v200_v15 = vlaneseq }
  0x53   :  { %957 = vmatpush3.bf16.msra.mxu0 %v1040_v14  ;;  %v1088_v60 = vld [vmem:[#allocation9 + $0x8] ss:$12 sps:$4 sm:$0xff]   ;;  %v473_v61 = vpack.c.bf16 %v1383_v59, %v1383_v59  ;;  %v1089_v62 = vld [vmem:[#allocation10 + $0x38] sm:$0xff]   ;;  %v1096_v6 = vld [vmem:[#allocation10] sm:$0xff]  }
  0x54   :  { %958 = vmatprep.subr.bf16.mxu0 %v1266_v0  ;;  %v1090_v63 = vld [vmem:[#allocation10 + $0x30] sm:$0xff]   ;;  %v1091_v1 = vld [vmem:[#allocation10 + $0x28] sm:$0xff]   ;;  %v1093_v3 = vld [vmem:[#allocation10 + $0x18] sm:$0xff]  }
  0x55   :  { %352 = vmatpush1.bf16.msra.mxu1 %v1043_v16  ;;  %v1094_v4 = vld [vmem:[#allocation10 + $0x10] sm:$0xff]   ;;  %v1095_v5 = vld [vmem:[#allocation10 + $0x8] sm:$0xff]   ;;  %v201_v16 = vshrl.u32 %v200_v15, 7 }
  0x56   :  { %353 = vmatprep.subr.bf16.mxu1 %v1045_v18  ;;  %v198_v18 = vld [vmem:[%s1416_s5] sm:$0x7] }
  0x57   :  { %959 = vmatpush3.bf16.msra.mxu0 %v1044_v17  ;;  %v202_v17 = vsub.s32 0, %v201_v16 }
  0x58   :  { %960 = vmatprep.subr.bf16.mxu0 %v1266_v0 }
  0x59   :  { %354 = vmatpush1.bf16.msra.mxu1 %v1047_v19  ;;  %v203_v19 = vrot.slane %v198_v18, %v202_v17 }
  0x5a   :  { %355 = vmatprep.subr.bf16.mxu1 %v1049_v21 }
  0x5b   :  { %961 = vmatpush3.bf16.msra.mxu0 %v1048_v20  ;;  %v206_v20 = vsub.s32 1, %v201_v16 }
  0x5c   :  { %962 = vmatprep.subr.bf16.mxu0 %v1266_v0 }
  0x5d   :  { %356 = vmatpush1.bf16.msra.mxu1 %v1051_v22 }
  0x5e   :  { %357 = vmatprep.subr.bf16.mxu1 %v1053_v24 }
  0x5f   :  { %963 = vmatpush3.bf16.msra.mxu0 %v1052_v23  ;;  %v207_v23 = vrot.slane %v198_v18, %v206_v20 }
  0x60   :  { %964 = vmatprep.subr.bf16.mxu0 %v1266_v0 }
  0x61   :  { %358 = vmatpush1.bf16.msra.mxu1 %v1055_v25 }
  0x62   :  { %602 = vmatprep.subr.bf16.mxu1 %v1059_v27 }
  0x63   :  { %965 = vmatpush3.bf16.msra.mxu0 %v1056_v26 }
  0x64   :  { %970 = vmatprep.subr.bf16.mxu0 %v1266_v0 }
 0x106   :  { %v158_v30 = vpop.f32.mrf.mxu0 }
 0x107   :  { %v159_v31 = vadd.f32 %v852_v29, %v158_v30 }
 0x108   :  { %v948_v32 = vpop.f32.mrf.mxu0 }
 0x109   :  { %v164_v33 = vmax.f32 %v159_v31, 0.0 }
 0x10a   :  { %v161_v34 = vpop.f32.mrf.mxu0 }
 0x10b   :  { %v165_v37 = vpack.c.bf16 %v164_v33, %v164_v33 }
 0x10c   :  { %v949_v39 = vpop.f32.mrf.mxu0 }
 0x10d   :  { %376 = vmatmul.mubr.bf16.vlgmr.msra.gmra.mxu1 %v165_v37  ;;  %967 = vmatmul.mubr.bf16.vlgmr.msra.gmra.mxu0 %v165_v37  ;;  %v210_v37 = vsub.s32 2, %v201_v16  ;;  %v879_v39 = vld [vmem:[%s1418_s7] ss:$0 sm:$0xff]  ;;  %s1269_s7 = smov [#allocation14]  }
 0x10e   :  { %603 = vmatpush1.bf16.msra.mxu1 %v1057_v35  ;;  %971 = vmatpush3.bf16.msra.mxu0 %v1078_v36  ;;  %s837_s29 = sshll.u32 %s1269_s7, 4  ;;  %s838_s29 = int_to_ptr.vmem [resolvable:$true] %s837_s29 }
 0x10f   :  { %604 = vmatprep.subr.bf16.mxu1 %v1062_v38  ;;  %972 = vmatprep.subr.bf16.mxu0 %v1266_v0  ;;  %s1207_s30 = scalar_lea.vmem %s838_s29, 128  ;;  %p1212_p12 = scmp.lt.s32.totalorder %s838_s29, %s838_s29 }
 0x110   :  { %634 = vmatprep.mubr.bf16.mxu1 %v1268_v28  ;;  %986 = vmatprep.mubr.msk.bf16.mxu0 %vm1267_vm0, %v1266_v0  ;;  %p1208_p11 = scmp.ne.s32.totalorder %s838_s29, %s1207_s30  ;;  %p1213_p13 = scmp.lt.s32.totalorder %s1207_s30, %s1207_s30 }
 0x112   :  { %605 = vmatpush1.bf16.msra.mxu1 %v1060_v40  ;;  %973 = vmatpush3.bf16.msra.mxu0 %v1082_v41  ;;  %v211_v40 = vrot.slane %v198_v18, %v210_v37  ;;  %p1214_p0 = por %p1213_p13, %p1212_p12 }
 0x113   :  { %606 = vmatprep.subr.bf16.mxu1 %v1065_v42  ;;  %974 = vmatprep.subr.bf16.mxu0 %v1266_v0 }
 0x114   :  { %p1215_p1 = pnand %p1214_p0, %p1208_p11 }
 0x116   :  { %607 = vmatpush1.bf16.msra.mxu1 %v1063_v43  ;;  %975 = vmatpush3.bf16.msra.mxu0 %v1083_v44 }
 0x117   :  { %608 = vmatprep.subr.bf16.mxu1 %v1068_v45  ;;  %976 = vmatprep.subr.bf16.mxu0 %v1266_v0 }
 0x11a   :  { %609 = vmatpush1.bf16.msra.mxu1 %v1066_v46  ;;  %977 = vmatpush3.bf16.msra.mxu0 %v1084_v47 }
 0x11b   :  { %610 = vmatprep.subr.bf16.mxu1 %v1071_v48  ;;  %978 = vmatprep.subr.bf16.mxu0 %v1266_v0 }
 0x11e   :  { %611 = vmatpush1.bf16.msra.mxu1 %v1069_v49  ;;  %979 = vmatpush3.bf16.msra.mxu0 %v1085_v50 }
 0x11f   :  { %612 = vmatprep.subr.bf16.mxu1 %v1074_v51  ;;  %980 = vmatprep.subr.bf16.mxu0 %v1266_v0 }
 0x122   :  { %613 = vmatpush1.bf16.msra.mxu1 %v1072_v52  ;;  %981 = vmatpush3.bf16.msra.mxu0 %v1086_v53 }
 0x123   :  { %614 = vmatprep.subr.bf16.mxu1 %v1077_v54  ;;  %982 = vmatprep.subr.bf16.mxu0 %v1266_v0 }
 0x126   :  { %615 = vmatpush1.bf16.msra.mxu1 %v1075_v55  ;;  %983 = vmatpush3.bf16.msra.mxu0 %v1087_v56 }
 0x127   :  { %616 = vmatprep.subr.bf16.mxu1 %v1081_v57  ;;  %984 = vmatprep.subr.bf16.mxu0 %v1266_v0 }
 0x12a   :  { %617 = vmatpush1.bf16.msra.mxu1 %v1079_v58  ;;  %985 = vmatpush3.bf16.msra.mxu0 %v1088_v60 }
 0x12b   :  { %990 = vmatprep.subr.bf16.mxu1 %v1266_v0 }
 0x12d   :  { %635 = vmatmul.mubr.bf16.vlgmr.msra.gmra.mxu1 %v473_v61  ;;  %987 = vmatmul.mubr.bf16.vlgmr.msra.gmra.mxu0 %v473_v61 }
 0x12e   :  { %1006 = vmatprep.mubr.msk.bf16.mxu1 %vm1267_vm0, %v1266_v0  ;;  %991 = vmatpush3.bf16.msra.mxu1 %v1089_v62 }
 0x12f   :  { %992 = vmatprep.subr.bf16.mxu1 %v1266_v0 }
 0x132   :  { %993 = vmatpush3.bf16.msra.mxu1 %v1090_v63 }
 0x133   :  { %994 = vmatprep.subr.bf16.mxu1 %v1266_v0 }
 0x136   :  { %995 = vmatpush3.bf16.msra.mxu1 %v1091_v1 }
 0x137   :  { %996 = vmatprep.subr.bf16.mxu1 %v1266_v0 }
 0x13a   :  { %997 = vmatpush3.bf16.msra.mxu1 %v1092_v2 }
 0x13b   :  { %998 = vmatprep.subr.bf16.mxu1 %v1266_v0 }
 0x13e   :  { %999 = vmatpush3.bf16.msra.mxu1 %v1093_v3 }
 0x13f   :  { %1000 = vmatprep.subr.bf16.mxu1 %v1266_v0 }
 0x142   :  { %1001 = vmatpush3.bf16.msra.mxu1 %v1094_v4 }
 0x143   :  { %1002 = vmatprep.subr.bf16.mxu1 %v1266_v0 }
 0x146   :  { %1003 = vmatpush3.bf16.msra.mxu1 %v1095_v5 }
 0x147   :  { %1004 = vmatprep.subr.bf16.mxu1 %v1266_v0 }
 0x14a   :  { %1005 = vmatpush3.bf16.msra.mxu1 %v1096_v6 }
 0x1cd   :  { %v377_v7 = vpop.f32.mrf.mxu1  ;;  %v418_v8 = vpop.f32.mrf.mxu0 }
 0x1ce   :  { %v378_v21 = vadd.f32 %v377_v7, %v203_v19  ;;  %v419_v44 = vadd.f32 %v418_v8, %v211_v40 }
 0x1cf   :  { %v379_v9 = vpop.f32.mrf.mxu1  ;;  %v968_v10 = vpop.f32.mrf.mxu0 }
 0x1d0   :  { %v380_v30 = vadd.f32 %v379_v9, %v207_v23 }
 0x1d1   :  { %v381_v11 = vpop.f32.mrf.mxu1  ;;  %v421_v12 = vpop.f32.mrf.mxu0 }
 0x1d3   :  { %v382_v13 = vpop.f32.mrf.mxu1  ;;  %v969_v14 = vpop.f32.mrf.mxu0 }
 0x1ed   :  { %v636_v0 = vpop.f32.mrf.mxu1  ;;  %v677_v22 = vpop.f32.mrf.mxu0 }
 0x1ee   :  { %v683_v24 = vadd.f32 %v636_v0, %v378_v21  ;;  %v697_v42 = vadd.f32 %v879_v39, %v677_v22 }
 0x1ef   :  { %v638_v25 = vpop.f32.mrf.mxu1  ;;  %v988_v26 = vpop.f32.mrf.mxu0 }
 0x1f0   :  { %v904_v27 = vmul.f32 -1.442695, %v683_v24  ;;  %v690_v33 = vadd.f32 %v638_v25, %v380_v30 }
 0x1f1   :  { %v640_v28 = vpop.f32.mrf.mxu1  ;;  %v680_v29 = vpop.f32.mrf.mxu0 }
 0x1f2   :  { %1097 = vpow2.f32 %v904_v27  ;;  %v905_v34 = vmul.f32 -1.442695, %v690_v33 }
 0x1f3   :  { %v641_v31 = vpop.f32.mrf.mxu1  ;;  %v989_v32 = vpop.f32.mrf.mxu0 }
 0x1f4   :  { %1099 = vpow2.f32 %v905_v34 }
 0x1ff   :  { %v1098_v35 = vpop.eup %1097 }
 0x200   :  { %v687_v36 = vadd.f32 1.0, %v1098_v35 }
 0x201   :  { %v1100_v38 = vpop.eup %1099 }
 0x202   :  { %1101 = vrcp.f32 %v687_v36  ;;  %v694_v41 = vadd.f32 1.0, %v1100_v38 }
 0x204   :  { %1103 = vrcp.f32 %v694_v41 }
 0x20f   :  { %v1102_v43 = vpop.eup %1101 }
 0x210   :  { %v698_v45 = vmul.f32 %v1102_v43, %v697_v42 }
 0x211   :  { %v1104_v47 = vpop.eup %1103 }
 0x212   :  { %v699_v46 = vadd.f32 %v698_v45, %v419_v44  ;;  %v701_v48 = vsub.f32 1.0, %v1104_v47  ;;  %v703_v51 = vmul.f32 %v1104_v47, %v1383_v59 }
 0x214   :  { %1105 = vtanh.f32 %v699_v46 }
 0x221   :  { %v1106_v49 = vpop.eup %1105 }
 0x222   :  { %v702_v50 = vmul.f32 %v1106_v49, %v701_v48 }
 0x224   :  { %v704_v52 = vadd.f32 %v703_v51, %v702_v50 }
 0x226   :  { %v708_v53 = vpack.c.bf16 %v704_v52, %v704_v52  ;;  %706 = vst [vmem:[#allocation14] sm:$0xff] %v704_v52 }
 0x228   :  { %1007 = vmatmul.mubr.bf16.vlgmr.msra.gmra.mxu1 %v708_v53 }
 0x229   :  { %1218 = shalt.err (!%p1215_p1)
}
 0x22a   :  { %840 = dma.vmem_to_hbm [thread:$0]  %s838_s29, 128, %s1422_s11, [#allocation15]   ;;  %v906_v54 = vld [vmem:[#allocation12] ss:$0 sm:$0xff] }
 0x22b   :  { %s1270_s14 = smov [#allocation13]  }
 0x22c   :  { %s827_s4 = sshll.u32 %s1270_s14, 4  ;;  %s828_s4 = int_to_ptr.vmem [resolvable:$true] %s827_s4 }
 0x22d   :  { %s1227_s15 = scalar_lea.vmem %s828_s4, 128  ;;  %p1232_p3 = scmp.lt.s32.totalorder %s828_s4, %s828_s4 }
 0x22e   :  { %p1228_p2 = scmp.ne.s32.totalorder %s828_s4, %s1227_s15  ;;  %p1233_p4 = scmp.lt.s32.totalorder %s1227_s15, %s1227_s15 }
 0x230   :  { %p1234_p5 = por %p1233_p4, %p1232_p3 }
 0x232   :  { %p1235_p6 = pnand %p1234_p5, %p1228_p2 }
 0x2e8   :  { %v814_v55 = vpop.f32.mrf.mxu1 }
 0x2e9   :  { %v815_v56 = vadd.f32 %v906_v54, %v814_v55 }
 0x2ea   :  { %v1008_v57 = vpop.f32.mrf.mxu1 }
 0x2eb   :  { %820 = vst [vmem:[#allocation13] sm:$0xff] %v815_v56 }
 0x2ec   :  { %v817_v58 = vpop.f32.mrf.mxu1 }
 0x2ed   :  { %1238 = shalt.err (!%p1235_p6)
}
 0x2ee   :  { %830 = dma.vmem_to_hbm [thread:$0]  %s828_s4, 128, %s1421_s10, [#allocation6]   ;;  %v1009_v59 = vpop.f32.mrf.mxu1 }
 0x2ef   :  { %1253 = dma.done.wait [#allocation6], 128  }
 0x2f0   :  { %1254 = vsyncadd [#allocation6], 4294967168 }
 0x2f1   :  { %1255 = dma.done.wait [#allocation15], 128  }
 0x2f2   :  { %1256 = vsyncadd [#allocation15], 4294967168 }
 0x2f3   :  { %847 = vsyncpa [#allocation5], 1 }
 0x2f4   :  { %848 = vsyncpa [#allocation8], 1 }
 0x2f5   :  { %849 = vsyncpa [#allocation11], 1 }
 0x2f6   :  { %850 = vsyncpa [#allocation6], 1 }
 0x2f7   :  { %851 = vsyncpa [#allocation15], 1 }

</bundles_post_ra>
